<compile_context>
chip_gen: v7x
topology: tpu7x:2x2x1
jax: 0.10.0
libtpu: 0.0.40
codegen_flags: <defaults>
</compile_context>

<pallas_src>
import math

import jax
import jax.numpy as jnp
from jax.experimental import pallas as pl
from jax.experimental.pallas import tpu as pltpu


def _round_up(x, m):
    return ((x + m - 1) // m) * m


def _cdiv(a, b):
    return (a + b - 1) // b


def _vmem_capacity_bytes():
    try:
        return int(pltpu.get_tpu_info().vmem_capacity_bytes)
    except Exception:
        return 64 << 20          # conservative fallback (v7x per-TensorCore VMEM)


def _resident_spec(block_shape, single_buffer):
    """BlockSpec for an operand that stays resident in VMEM across all grid steps."""
    index_map = lambda *_: (0,) * len(block_shape)
    if single_buffer:
        try:  # grid-invariant block: a second pipeline buffer is pure waste
            return pl.BlockSpec(block_shape, index_map, pipeline_mode=pl.Buffered(1))
        except Exception:
            pass
    return pl.BlockSpec(block_shape, index_map)


def _cin_kernel(x0_ref, xl_ref, w_ref, b_ref, o_ref):
    # x0_ref: (H0p, N)                   original-input fields, lane-dense N = TB*K
    # xl_ref: (n_chunks, CHUNK, N)       layer-l fields, pre-chunked over hl
    # w_ref:  (n_chunks, O, CHUNK*H0p)   conv weight, pre-chunked, bf16 (or f32)
    # b_ref:  (O, 1) f32
    # o_ref:  (O, N)
    n_chunks, chunk, n = xl_ref.shape
    h0p = x0_ref.shape[0]
    o_ch = o_ref.shape[0]

    x0 = x0_ref[...]                                     # (H0p, N), input dtype (f32)

    def chunk_step(c, acc):
        # Interaction for `chunk` rows of xl; (CHUNK, H0p, N) stays in a few vregs.
        # Channel order within the chunk is hl_local*H0p + h0 (matches torch .view).
        z = (xl_ref[c][:, None, :] * x0[None, :, :]).reshape(chunk * h0p, n)
        # Consume it immediately on the MXU (bf16 operands, f32 accumulation).
        return acc + jnp.dot(w_ref[c], z.astype(w_ref.dtype),
                             preferred_element_type=jnp.float32)

    acc = jnp.zeros((o_ch, n), jnp.float32)
    if n_chunks <= 16:                                   # static full unroll
        for c in range(n_chunks):
            acc = chunk_step(c, acc)
    else:                                                # bounded live ranges, LLO visibility
        acc = jax.lax.fori_loop(0, n_chunks, chunk_step, acc, unroll=8)

    o_ref[...] = (acc + b_ref[...]).astype(o_ref.dtype)  # bias add in f32


def _choose_batch_tile(B, K, tile_bytes, tile_budget, target_lanes=1024):
    """Pick TB: TB*K lane-aligned (256 preferred for v6e/v7x MXU), fits the VMEM
    budget, and keeps >= 2 grid steps when the batch allows it (v7x megacore)."""
    base = None
    for align in (256, 128):
        b = align // math.gcd(K, align)
        if tile_bytes(b) <= tile_budget:
            base = b
            break
    if base is None:
        base = 128 // math.gcd(K, 128)        # keep stores unmasked even if tight
    tb = base
    cap = max(base, _round_up(B, base))       # never pad the batch past one tile
    while (tb * 2 <= cap and tb * 2 * K <= target_lanes
           and tile_bytes(tb * 2) <= tile_budget):
        tb *= 2
    while tb > base and _cdiv(B, tb) < 2:     # megacore: keep >= 2 grid steps
        tb //= 2
    return tb


def cin_forward(x0, xl, weight, bias, *, mxu_dtype=jnp.bfloat16):
    """x0: (B, H0, K), xl: (B, Hl, K), weight: (O, Hl*H0), bias: (O,) -> (B, O, K)."""
    B, H0, K = x0.shape
    Bx, Hl, Kx = xl.shape
    assert Bx == B and Kx == K
    O, C = weight.shape
    assert C == H0 * Hl, "Conv1d in_channels must equal H0 * Hl"

    in_dtype = x0.dtype
    itemsize = jnp.dtype(in_dtype).itemsize
    w_itemsize = jnp.dtype(mxu_dtype).itemsize

    H0p = _round_up(H0, 8)                    # makes the in-kernel reshape a free merge
    Hl8 = _round_up(Hl, 8)                    # estimate for VMEM sizing

    # ---- generation-aware VMEM budgeting --------------------------------------
    vmem_cap = _vmem_capacity_bytes()         # 128 MiB v5e/v6e, 64 MiB/TC v7x
    budget = (vmem_cap * 7) // 10             # sizing target for tiles + weights
    vmem_limit = (vmem_cap * 9) // 10         # scoped limit handed to Mosaic

    w_bytes = O * Hl8 * H0p * w_itemsize
    single_buffer_w = w_bytes > (2 << 20)     # only bother when the weight is big
    w_resident = w_bytes * (1 if single_buffer_w else 2) + 2 * O * 4

    def tile_bytes(tb):                        # double-buffered I/O tiles + f32 acc
        n = tb * K
        return 2 * (H0p + Hl8 + O) * n * itemsize + O * n * 4

    tile_budget = max(budget - w_resident, 2 << 20)
    target_lanes = 2048 if vmem_cap >= (96 << 20) else 1024
    TB = _choose_batch_tile(B, K, tile_bytes, tile_budget, target_lanes)
    Bp = _round_up(B, TB)
    n_steps = Bp // TB
    N = TB * K

    # ---- hl chunking: z_chunk = (CHUNK*H0p, N) stays within ~16 f32 vregs ------
    chunk = max(1, (16 * 4096) // (H0p * N * itemsize))
    chunk = min(chunk, Hl, max(1, 512 // H0p))       # also bound the MXU lhs width
    Hl_p = _round_up(Hl, chunk)
    n_chunks = Hl_p // chunk

    # ---- padding + one-time layout plumbing (outside the kernel) ---------------
    if Bp != B:
        x0 = jnp.pad(x0, ((0, Bp - B), (0, 0), (0, 0)))
        xl = jnp.pad(xl, ((0, Bp - B), (0, 0), (0, 0)))
    if H0p != H0:
        x0 = jnp.pad(x0, ((0, 0), (0, H0p - H0), (0, 0)))
    if Hl_p != Hl:
        xl = jnp.pad(xl, ((0, 0), (0, Hl_p - Hl), (0, 0)))

    # Fields-major, lane-dense layout (fields, Bp*K). For stacked CIN layers keep
    # activations in this layout between layers; only restore (B, O, K) at the end.
    x0_t = x0.transpose(1, 0, 2).reshape(H0p, Bp * K)
    xl3 = xl.transpose(1, 0, 2).reshape(n_chunks, chunk, Bp * K)

    w = jnp.pad(weight.reshape(O, Hl, H0),
                ((0, 0), (0, Hl_p - Hl), (0, H0p - H0)))
    w3 = (w.reshape(O, n_chunks, chunk, H0p)
           .transpose(1, 0, 2, 3)
           .reshape(n_chunks, O, chunk * H0p)
           .astype(mxu_dtype))
    b2 = bias.reshape(O, 1).astype(jnp.float32)

    flops = 2 * O * (Hl_p * H0p) * Bp * K + Hl_p * H0p * Bp * K
    bytes_accessed = ((H0p + Hl_p + O) * Bp * K * itemsize
                      + int(w3.size) * w_itemsize + O * 4)

    out_flat = pl.pallas_call(
        _cin_kernel,
        out_shape=jax.ShapeDtypeStruct((O, Bp * K), in_dtype),
        grid_spec=pltpu.PrefetchScalarGridSpec(
            num_scalar_prefetch=0,
            grid=(n_steps,),
            in_specs=[
                pl.BlockSpec((H0p, N), lambda i: (0, i)),
                pl.BlockSpec((n_chunks, chunk, N), lambda i: (0, 0, i)),
                _resident_spec((n_chunks, O, chunk * H0p), single_buffer_w),
                _resident_spec((O, 1), False),
            ],
            out_specs=pl.BlockSpec((O, N), lambda i: (0, i)),
        ),
        compiler_params=pltpu.CompilerParams(
            dimension_semantics=("parallel",),
            vmem_limit_bytes=int(vmem_limit)),
        cost_estimate=pl.CostEstimate(
            flops=int(flops), transcendentals=0, bytes_accessed=int(bytes_accessed)),
    )(x0_t, xl3, w3, b2)

    # Restore the PyTorch Conv1d NCL layout (B, O, K) and drop the batch padding.
    out = out_flat.reshape(O, Bp, K).transpose(1, 0, 2)
    return out[:B]


if __name__ == "__main__":
    # Small shapes consistent with the module: K = embedding dim,
    # Conv1d(in_channels=H0*Hl, out_channels=O, kernel_size=1).
    B, H0, Hl, K, O = 2, 8, 4, 16, 8

    key = jax.random.PRNGKey(0)
    k0, k1, k2, k3 = jax.random.split(key, 4)
    x0 = jax.random.normal(k0, (B, H0, K), dtype=jnp.float32)
    xl = jax.random.normal(k1, (B, Hl, K), dtype=jnp.float32)
    # Conv1d params: weight (O, in_channels, 1) squeezed to (O, in_channels), bias (O,)
    weight = jax.random.normal(k2, (O, Hl * H0), dtype=jnp.float32) * 0.1
    bias = jax.random.normal(k3, (O,), dtype=jnp.float32) * 0.1

    out = jax.block_until_ready(cin_forward(x0, xl, weight, bias))

    # Pure-JAX f32 reference (mirrors the PyTorch forward exactly).
    z_ref = (xl[:, :, None, :] * x0[:, None, :, :]).reshape(B, Hl * H0, K)
    ref = jnp.einsum("oc,bck->bok", weight, z_ref) + bias[None, :, None]

    assert out.shape == (B, O, K)
    # bf16 MXU operands with f32 accumulation -> tolerance loosened accordingly.
    assert jnp.allclose(out, ref, atol=3e-2, rtol=3e-2), \
        float(jnp.max(jnp.abs(out - ref)))
    print("KERNEL_OK")
</pallas_src>

<mosaic_0001>
module attributes {stable_mosaic.version = 11 : i64} {
  func.func @_cin_kernel(%arg0: i32, %arg1: memref<8x256xf32, #tpu.memory_space<vmem>>, %arg2: memref<1x4x256xf32, #tpu.memory_space<vmem>>, %arg3: memref<1x8x32xbf16, #tpu.memory_space<vmem>>, %arg4: memref<8x1xf32, #tpu.memory_space<vmem>>, %arg5: memref<8x256xf32, #tpu.memory_space<vmem>>) attributes {dimension_semantics = [#tpu.dimension_semantics<parallel>], iteration_bounds = array<i64: 1>, scalar_prefetch = 0 : i64, scratch_operands = 0 : i64, tpu.core_type = #tpu.core_type<tc>, window_params = [{transform_indices = @transform_0, window_bounds = array<i64: 8, 256>}, {transform_indices = @transform_1, window_bounds = array<i64: 1, 4, 256>}, {pipeline_mode = #tpu.pipeline_mode<synchronous>, transform_indices = @transform_2, window_bounds = array<i64: 1, 8, 32>}, {pipeline_mode = #tpu.pipeline_mode<synchronous>, transform_indices = @transform_3, window_bounds = array<i64: 8, 1>}, {transform_indices = @transform_4, window_bounds = array<i64: 8, 256>}]} {
    %c0 = arith.constant 0 : index
    %c0_0 = arith.constant 0 : index
    %0 = vector.load %arg1[%c0, %c0_0] : memref<8x256xf32, #tpu.memory_space<vmem>>, vector<8x256xf32>
    %cst = arith.constant 0.000000e+00 : f32
    %1 = vector.broadcast %cst : f32 to vector<8x256xf32>
    %c0_1 = arith.constant 0 : index
    %c0_2 = arith.constant 0 : index
    %c0_3 = arith.constant 0 : index
    %2 = vector.load %arg2[%c0_1, %c0_2, %c0_3] : memref<1x4x256xf32, #tpu.memory_space<vmem>>, vector<1x4x256xf32>
    %3 = vector.shape_cast %2 : vector<1x4x256xf32> to vector<4x256xf32>
    %4 = vector.shape_cast %3 : vector<4x256xf32> to vector<4x1x256xf32>
    %5 = vector.shape_cast %0 : vector<8x256xf32> to vector<1x8x256xf32>
    %6 = vector.broadcast %4 : vector<4x1x256xf32> to vector<4x8x256xf32>
    %7 = vector.broadcast %5 : vector<1x8x256xf32> to vector<4x8x256xf32>
    %8 = arith.mulf %6, %7 : vector<4x8x256xf32>
    %9 = vector.shape_cast %8 : vector<4x8x256xf32> to vector<32x256xf32>
    %c0_4 = arith.constant 0 : index
    %c0_5 = arith.constant 0 : index
    %c0_6 = arith.constant 0 : index
    %10 = vector.load %arg3[%c0_4, %c0_5, %c0_6] : memref<1x8x32xbf16, #tpu.memory_space<vmem>>, vector<1x8x32xbf16>
    %11 = vector.shape_cast %10 : vector<1x8x32xbf16> to vector<8x32xbf16>
    %12 = arith.truncf %9 : vector<32x256xf32> to vector<32x256xbf16>
    %cst_7 = arith.constant dense<0.000000e+00> : vector<8x256xf32>
    %13 = tpu.matmul %11, %12, %cst_7 {dimension_numbers = #tpu.dot_dimension_numbers<[1], [0], [0], [1], [0, 0, 1, 1], [], []>} : vector<8x32xbf16>, vector<32x256xbf16>, vector<8x256xf32> -> vector<8x256xf32>
    %14 = arith.addf %1, %13 : vector<8x256xf32>
    %c0_8 = arith.constant 0 : index
    %c0_9 = arith.constant 0 : index
    %15 = vector.load %arg4[%c0_8, %c0_9] : memref<8x1xf32, #tpu.memory_space<vmem>>, vector<8x1xf32>
    %16 = vector.broadcast %15 : vector<8x1xf32> to vector<8x256xf32>
    %17 = arith.addf %14, %16 : vector<8x256xf32>
    %c0_10 = arith.constant 0 : index
    %c0_11 = arith.constant 0 : index
    %18 = vector.load %arg5[%c0_10, %c0_11] : memref<8x256xf32, #tpu.memory_space<vmem>>, vector<8x256xf32>
    tpu.vector_store %arg5[%c0_10, %c0_11], %17 {strides = array<i32>} : memref<8x256xf32, #tpu.memory_space<vmem>>, vector<8x256xf32>,
    return
  }
  func.func @transform_0(%arg0: i32) -> (i32, i32) {
    %c0_i32 = arith.constant 0 : i32
    %c0_i32_0 = arith.constant 0 : i32
    return %c0_i32, %arg0 : i32, i32
  }
  func.func @transform_1(%arg0: i32) -> (i32, i32, i32) {
    %c0_i32 = arith.constant 0 : i32
    %c0_i32_0 = arith.constant 0 : i32
    %c0_i32_1 = arith.constant 0 : i32
    return %c0_i32, %c0_i32_0, %arg0 : i32, i32, i32
  }
  func.func @transform_2(%arg0: i32) -> (i32, i32, i32) {
    %c0_i32 = arith.constant 0 : i32
    %c0_i32_0 = arith.constant 0 : i32
    %c0_i32_1 = arith.constant 0 : i32
    %c0_i32_2 = arith.constant 0 : i32
    return %c0_i32, %c0_i32_0, %c0_i32_1 : i32, i32, i32
  }
  func.func @transform_3(%arg0: i32) -> (i32, i32) {
    %c0_i32 = arith.constant 0 : i32
    %c0_i32_0 = arith.constant 0 : i32
    %c0_i32_1 = arith.constant 0 : i32
    return %c0_i32, %c0_i32_0 : i32, i32
  }
  func.func @transform_4(%arg0: i32) -> (i32, i32) {
    %c0_i32 = arith.constant 0 : i32
    %c0_i32_0 = arith.constant 0 : i32
    return %c0_i32, %arg0 : i32, i32
  }
}

</mosaic_0001>

<bundles_post_ra>
// kernel: tpu_custom_call.1
= control target key start
LH: loop header
LB: loop body
LE: loop exit
PB: predicated region body
PF: predicated region fallthrough
CT: control target
= control target key end

     0   :  { %9 = vsyncpa [#allocation3], 0  ;;  %s297_s0 = inlined_call_operand.hbm [shape: f32[8,256], index: 0, kind: input, shape index: {}]   ;;  %s298_s1 = inlined_call_operand.vmem [shape: f32[1,4,256], index: 1, kind: input, shape index: {}]   ;;  %s299_s2 = inlined_call_operand.vmem [shape: bf16[1,8,32], index: 2, kind: input, shape index: {}]   ;;  %s300_s3 = inlined_call_operand.vmem [shape: f32[8,1], index: 3, kind: input, shape index: {}]   ;;  %s301_s4 = inlined_call_operand.hbm [shape: f32[8,256], index: 4, kind: output, shape index: {}]  }
   0x1   :  { %10 = vsyncpa [#allocation4], 0  ;;  %s235_s15 = smov [#allocation2]   ;;  %s187_s19 = scalar_lea.hbm %s297_s0, 256 }
   0x2   :  { %s17_s16 = sshll.u32 %s235_s15, 4  ;;  %p188_p0 = scmp.ne.s32.totalorder %s297_s0, %s187_s19  ;;  %s18_s16 = int_to_ptr.vmem [resolvable:$true] %s17_s16 }
   0x3   :  { %p191_p1 = scmp.lt.u32.totalorder %s187_s19, %s297_s0 }
   0x5   :  { %p193_p2 = pnand %p191_p1, %p188_p0 }
   0x7   :  { %196 = shalt.err (!%p193_p2)
}
   0x8   :  { %s197_s24 = scalar_lea.vmem %s18_s16, 256  ;;  %p202_p4 = scmp.lt.s32.totalorder %s18_s16, %s18_s16 }
   0x9   :  { %p198_p3 = scmp.ne.s32.totalorder %s18_s16, %s197_s24  ;;  %p203_p5 = scmp.lt.s32.totalorder %s197_s24, %s197_s24 }
   0xb   :  { %p204_p6 = por %p203_p5, %p202_p4 }
   0xd   :  { %p205_p7 = pnand %p204_p6, %p198_p3 }
   0xf   :  { %208 = shalt.err (!%p205_p7)
}
  0x10   :  { %20 = dma.hbm_to_vmem [thread:$0]  %s297_s0, 256, %s18_s16, [#allocation3]  }
  0x11   :  { %231 = dma.done.wait [#allocation3], 256  }
  0x12   :  { %232 = vsyncadd [#allocation3], 4294967040  ;;  %v46_v0 = vlaneseq  ;;  %v236_v1 = vmov 1966171168   ;;  %v237_v3 = vmov 0   ;;  %v112_v12 = vld [vmem:[%s300_s3] sm:$0xff] }
  0x13   :  { %v44_v2 = vunpack.c.l.s4 %v236_v1  ;;  %154 = vmatprep.mubr.bf16.mxu0 %v237_v3  ;;  %186 = vset.pattern.permute.xlu0 %v237_v3  ;;  %v180_v9 = vld.sshfl [vmem:[%s298_s1] sm:$0xff pattern:$0x75316420]  ;;  %v32_v13 = vld [vmem:[#allocation2 + $0x8] sm:$0xff]  ;;  %vm118_vm0 = vcmask 261120   ;;  %s238_s30 = smov [#allocation5]  }
  0x14   :  { %v47_v4 = vshrl.u32 %v46_v0, 7  ;;  %v42_v10 = vcombine.high %v180_v9, %v180_v9  ;;  %v31_v14 = vld [vmem:[#allocation2] sm:$0xff]  ;;  %115 = vperm.xlu0 %186, %v112_v12   ;;  %s171_s5 = sshll.u32 %s238_s30, 4  ;;  %s172_s5 = int_to_ptr.vmem [resolvable:$true] %s171_s5 }
  0x15   :  { %v45_v5 = vunpack.c.0.s8 %v44_v2  ;;  %v107_v38 = vld [vmem:[%s299_s2] sm:$0xf]  ;;  %s209_s6 = scalar_lea.vmem %s172_s5, 256  ;;  %p214_p9 = scmp.lt.s32.totalorder %s172_s5, %s172_s5 }
  0x16   :  { %v65_v7 = vsub.s32 1, %v47_v4  ;;  %v61_v8 = vsub.s32 0, %v47_v4  ;;  %p210_p8 = scmp.ne.s32.totalorder %s172_s5, %s209_s6  ;;  %p215_p10 = scmp.lt.s32.totalorder %s209_s6, %s209_s6 }
  0x17   :  { %v48_v6 = vsub.s32 %v45_v5, %v47_v4 }
  0x18   :  { %p216_p11 = por %p215_p10, %p214_p9 }
  0x19   :  { %v49_v11 = vrot.slane %v180_v9, %v48_v6  ;;  %v56_v15 = vrot.slane %v42_v10, %v48_v6 }
  0x1a   :  { %p217_p12 = pnand %p216_p11, %p210_p8 }
  0x1b   :  { %v66_v16 = vrot.slane %v49_v11, %v65_v7  ;;  %v62_v17 = vrot.slane %v49_v11, %v61_v8  ;;  %v57_v18 = vcombine.high %v49_v11, %v49_v11  ;;  %v74_v19 = vrot.slane %v56_v15, %v65_v7 }
  0x1c   :  { %v70_v21 = vrot.slane %v56_v15, %v61_v8  ;;  %v58_v23 = vcombine.high %v56_v15, %v56_v15 }
  0x1d   :  { %v100_v20 = vmul.f32 %v66_v16, %v32_v13  ;;  %v99_v22 = vmul.f32 %v62_v17, %v31_v14  ;;  %v82_v24 = vrot.slane %v57_v18, %v65_v7  ;;  %v78_v25 = vrot.slane %v57_v18, %v61_v8 }
  0x1e   :  { %v102_v26 = vmul.f32 %v74_v19, %v32_v13  ;;  %v101_v27 = vmul.f32 %v70_v21, %v31_v14  ;;  %v90_v28 = vrot.slane %v58_v23, %v65_v7  ;;  %v86_v30 = vrot.slane %v58_v23, %v61_v8 }
  0x1f   :  { %v104_v29 = vmul.f32 %v82_v24, %v32_v13  ;;  %v103_v31 = vmul.f32 %v78_v25, %v31_v14 }
  0x20   :  { %v109_v32 = vpack.c.bf16 %v102_v26, %v100_v20  ;;  %v108_v33 = vpack.c.bf16 %v101_v27, %v99_v22  ;;  %v106_v34 = vmul.f32 %v90_v28, %v32_v13  ;;  %v105_v35 = vmul.f32 %v86_v30, %v31_v14 }
  0x22   :  { %122 = vmatprep.subr.bf16.mxu0 %v109_v32  ;;  %v111_v36 = vpack.c.bf16 %v106_v34, %v104_v29  ;;  %v110_v37 = vpack.c.bf16 %v105_v35, %v103_v31 }
  0x23   :  { %123 = vmatpush1.bf16.msra.mxu0 %v108_v33 }
  0x24   :  { %124 = vmatprep.subr.bf16.mxu0 %v111_v36 }
  0x27   :  { %125 = vmatpush1.bf16.msra.mxu0 %v110_v37 }
  0x2a   :  { %181 = vmatmul.mubr.msk.bf16.vlgmr.msra.gmra.mrb[0].mxu0 %vm118_vm0, %v107_v38 }
  0x93   :  { %v116_v39 = vpop.permute.xlu0 %115 }
  0xfd   :  { %v156_v40 = vpop.f32.mrb[0].mxu0 }
  0xfe   :  { %v157_v41 = vadd.f32 %v156_v40, %v116_v39  ;;  %v158_v42 = vpop.f32.mrb[1].mxu0 }
  0xff   :  { %v159_v43 = vadd.f32 %v158_v42, %v116_v39  ;;  %v160_v44 = vpop.f32.mrb[2].mxu0 }
 0x100   :  { %163 = vst [vmem:[#allocation5] sm:$0xff] %v157_v41  ;;  %v161_v45 = vpop.f32.mrb[3].mxu0 }
 0x101   :  { %164 = vst [vmem:[#allocation5 + $0x8] sm:$0xff] %v159_v43 }
 0x102   :  { %220 = shalt.err (!%p217_p12)
}
 0x103   :  { %s221_s8 = scalar_lea.hbm %s301_s4, 256 }
 0x104   :  { %p222_p13 = scmp.ne.s32.totalorder %s301_s4, %s221_s8  ;;  %p225_p0 = scmp.lt.u32.totalorder %s221_s8, %s301_s4 }
 0x106   :  { %p227_p1 = pnand %p225_p0, %p222_p13 }
 0x108   :  { %230 = shalt.err (!%p227_p1)
}
 0x109   :  { %174 = dma.vmem_to_hbm [thread:$0]  %s172_s5, 256, %s301_s4, [#allocation4]  }
 0x10a   :  { %233 = dma.done.wait [#allocation4], 256  }
 0x10b   :  { %234 = vsyncadd [#allocation4], 4294967040 }
 0x10c   :  { %178 = vsyncpa [#allocation3], 1 }
 0x10d   :  { %179 = vsyncpa [#allocation4], 1 }

</bundles_post_ra>
